<compile_context>
chip_gen: v7x
topology: tpu7x:2x2x1
jax: 0.10.0
libtpu: 0.0.40
codegen_flags: <defaults>
</compile_context>

<pallas_src>
import functools

import numpy as np
import jax
import jax.numpy as jnp
from jax.experimental import pallas as pl
from jax.experimental.pallas import tpu as pltpu


def _round_up(x, m):
    return (x + m - 1) // m * m


def _sum2d(x):
    # (R, C) -> (1, 1): sublane reduce first (plain VALU vreg adds), then a
    # single cross-lane XLU pass on the final row.
    return jnp.sum(jnp.sum(x, axis=0, keepdims=True), axis=1, keepdims=True)


def _vmem_capacity_bytes():
    try:
        info = pltpu.get_tpu_info()
        cap = getattr(info, "vmem_capacity_bytes", None)
        if cap:
            return int(cap)
    except Exception:
        pass
    return 64 * 1024 * 1024  # conservative default (v7x per-TC VMEM)


def _vmem_limit_bytes():
    cap = _vmem_capacity_bytes()
    return min(int(cap * 0.85), 112 * 1024 * 1024)


def _dft_cos_sin(n_fft):
    n = np.arange(n_fft)
    # torch.hann_window(n_fft) (periodic=True)
    win = 0.5 - 0.5 * np.cos(2.0 * np.pi * n / n_fft)
    # torchaudio Spectrogram(normalized=True): divide by sqrt(sum(win^2))
    norm = 1.0 / np.sqrt(np.sum(win * win))
    k = np.arange(n_fft // 2 + 1)
    ang = 2.0 * np.pi * np.outer(n, k) / n_fft
    cw = (win[:, None] * np.cos(ang) * norm).astype(np.float32)
    sw = (win[:, None] * (-np.sin(ang)) * norm).astype(np.float32)
    return cw, sw


def _padded_basis(n_fft, c_pad, f_pad):
    # (c_pad, 2*f_pad): [cos | -sin]; zero rows beyond n_fft, zero padded freqs.
    cw, sw = _dft_cos_sin(n_fft)
    f = cw.shape[1]
    basis = np.zeros((c_pad, 2 * f_pad), np.float32)
    basis[:n_fft, :f] = cw
    basis[:n_fft, f_pad:f_pad + f] = sw
    return basis


def _pick_tile_t(n_frames, n_batch, f_pad, c_pad):
    """Frames per grid step, sized from the actual VMEM capacity."""
    vmem = _vmem_capacity_bytes()
    basis_bytes = c_pad * 2 * f_pad * 2                  # bf16, single-buffered
    budget = int(vmem * 0.55) - basis_bytes
    per_frame = (2 * 2 * n_batch * c_pad * 2             # yt+yp tiles, 2 bufs, bf16
                 + 16 * f_pad * 4)                       # in-flight f32 spectra/logs
    cap = max(8, budget // max(per_frame, 1))
    # Keep >= 2 grid steps when possible (v7x: two TCs on the "parallel" axis).
    two_way = max(8, _round_up(-(-n_frames // 2), 8))
    tile = min(cap, 1024, two_way)
    # MXU M-alignment: each matmul's M is tile_t (2x256^2 MXU on v6e/v7x).
    if tile >= 256:
        tile = (tile // 256) * 256
    else:
        tile = max(8, (tile // 8) * 8)
    return tile


def _basis_spec(block_shape, basis_bytes):
    index_map = lambda i: (0, 0)
    # Constant-index_map operand: fetched once, so default double buffering
    # only doubles its VMEM footprint.  Single-buffer it when it is big enough
    # to matter (large n_fft); tiny bases keep the plain default spec.
    if basis_bytes >= (1 << 20) and hasattr(pl, "Buffered"):
        try:
            return pl.BlockSpec(block_shape, index_map,
                                pipeline_mode=pl.Buffered(1))
        except TypeError:
            pass
    return pl.BlockSpec(block_shape, index_map)


def _sss_kernel(yt_ref, yp_ref, basis_ref, out_ref, *, n_batch, f_pad, eps2):
    """One frame-tile of the single-scale spectral loss.

    yt_ref, yp_ref : (B, tile_t, c_pad) bf16 framed true / predicted signals
                     (rows >= true frame count and lanes >= n_fft are zeros)
    basis_ref      : (c_pad, 2*f_pad) bf16 windowed + normalized [cos | -sin]
    out_ref        : (1, b_rows, 128) f32 per-tile partials; row b:
                     lane 0: sum(a) + sum(b)      with a=|S_t|^2, b=|S_p|^2
                     lane 1: sum(sqrt(a*b))
                     lane 2: sum |ln max(a,eps^2) - ln max(b,eps^2)|
    """
    b_rows = out_ref.shape[1]
    sub = jax.lax.broadcasted_iota(jnp.int32, (b_rows, 128), 0)
    lane = jax.lax.broadcasted_iota(jnp.int32, (b_rows, 128), 1)
    block = jnp.zeros((b_rows, 128), jnp.float32)
    basis = basis_ref[...]

    for b in range(n_batch):                    # static small batch loop
        # One lane-dense MXU matmul per (batch, signal); f32 accumulation.
        spec_t = jnp.dot(yt_ref[b], basis, preferred_element_type=jnp.float32)
        spec_p = jnp.dot(yp_ref[b], basis, preferred_element_type=jnp.float32)
        a = spec_t[:, :f_pad] ** 2 + spec_t[:, f_pad:] ** 2      # |S_true|^2
        c = spec_p[:, :f_pad] ** 2 + spec_p[:, f_pad:] ** 2      # |S_pred|^2
        cross = jnp.sqrt(a * c)                                  # S_true*S_pred
        la = jnp.log(jnp.maximum(a, eps2))
        lc = jnp.log(jnp.maximum(c, eps2))
        s_ab = _sum2d(a + c)
        s_x = _sum2d(cross)
        s_l1 = _sum2d(jnp.abs(la - lc))
        vals = (jnp.where(lane == 0, s_ab, 0.0)
                + jnp.where(lane == 1, s_x, 0.0)
                + jnp.where(lane == 2, s_l1, 0.0))
        block = block + jnp.where(sub == b, vals, 0.0)

    out_ref[...] = block[None, :, :]


@functools.partial(jax.jit, static_argnames=("n_fft", "overlap", "eps"))
def sss_loss_pallas(x_true, x_pred, n_fft, overlap=0.75, eps=1e-7):
    # TODO(synk): use_mel=True path (librosa mel filterbank matmul) not
    # implemented; this matches the default use_mel=False configuration.
    if x_true.ndim == 3:
        x_true = jnp.squeeze(x_true, axis=-2)
    if x_pred.ndim == 3:
        x_pred = jnp.squeeze(x_pred, axis=-2)
    B, L = x_true.shape
    hop = int(n_fft * (1 - overlap))
    if hop < 1 or L < n_fft:
        raise ValueError("invalid n_fft / hop / signal length")

    F = n_fft // 2 + 1
    f_pad = _round_up(F, 128)
    c_pad = _round_up(n_fft, 128)
    K = -(-n_fft // hop)                      # frame spans K hop-blocks
    T = 1 + (L - n_fft) // hop                # center=False frame count
    tile_t = _pick_tile_t(T, B, f_pad, c_pad)
    num_tiles = -(-T // tile_t)
    t_pad = num_tiles * tile_t
    b_rows = max(8, _round_up(B, 8))

    def to_frames(x):
        # (B, L) -> (B, t_pad, c_pad) lane-dense frames; frame t holds samples
        # [t*hop, t*hop + n_fft).  Rows >= T and lanes >= n_fft are exact
        # zeros, so padding contributes exactly zero to all three sums.
        n_blocks = T + K
        need = n_blocks * hop
        xp = jnp.pad(x.astype(jnp.float32),
                     ((0, 0), (0, max(0, need - L))))[:, :need]
        rows = xp.reshape(B, n_blocks, hop)
        fr = jnp.concatenate([rows[:, s:s + T, :] for s in range(K)], axis=2)
        fr = fr[:, :, :n_fft]
        fr = jnp.pad(fr, ((0, 0), (0, t_pad - T), (0, c_pad - n_fft)))
        return fr.astype(jnp.bfloat16)

    yt = to_frames(x_true)
    yp = to_frames(x_pred)
    basis_np = _padded_basis(n_fft, c_pad, f_pad)
    basis = jnp.asarray(basis_np, dtype=jnp.bfloat16)

    kernel = functools.partial(_sss_kernel, n_batch=B, f_pad=f_pad,
                               eps2=float(eps) * float(eps))

    frame_spec = pl.BlockSpec((B, tile_t, c_pad), lambda i: (0, i, 0))

    parts = pl.pallas_call(
        kernel,
        out_shape=jax.ShapeDtypeStruct((num_tiles, b_rows, 128), jnp.float32),
        grid_spec=pltpu.PrefetchScalarGridSpec(
            num_scalar_prefetch=0,
            grid=(num_tiles,),
            in_specs=[
                frame_spec,                                        # true frames
                frame_spec,                                        # pred frames
                _basis_spec((c_pad, 2 * f_pad), basis_np.size * 2) # DFT basis
            ],
            out_specs=pl.BlockSpec((1, b_rows, 128), lambda i: (i, 0, 0)),
        ),
        compiler_params=pltpu.CompilerParams(
            dimension_semantics=("parallel",),
            vmem_limit_bytes=_vmem_limit_bytes()),
    )(yt, yp, basis)

    sums = jnp.sum(parts, axis=0)               # (b_rows, 128)
    s_ab = sums[:B, 0]                          # sum a + sum b      per batch
    s_x = sums[:B, 1]                           # sum sqrt(a*b)      per batch
    l1 = jnp.sum(sums[:B, 2])                   # sum |ln a - ln b|
    dsq = jnp.maximum(s_ab - 2.0 * s_x, 0.0)    # sum (S_t - S_p)^2
    ssq = s_ab + 2.0 * s_x                      # sum (S_t + S_p)^2
    converge_term = jnp.mean(jnp.sqrt(dsq) / jnp.sqrt(ssq))
    # 0.5 converts squared-magnitude logs to magnitude logs; /ln(10) -> log10.
    log_term = 0.5 * l1 / (B * T * F) / float(np.log(10.0))
    return converge_term + log_term


def rss_loss_pallas(x_true, x_pred, key, fft_min, fft_max, n_scale,
                    overlap=0.75, eps=1e-7):
    # torch.randint(fft_min, fft_max + 1, (n_scale,)) equivalent; draws are
    # materialized so each scale gets a statically-shaped kernel, and repeated
    # draws are deduplicated + weighted (same value, fewer compiles/launches).
    n_ffts = np.asarray(
        jax.random.randint(key, (n_scale,), fft_min, fft_max + 1))
    uniq, counts = np.unique(n_ffts, return_counts=True)
    score = jnp.float32(0.0)
    for n_fft, cnt in zip(uniq, counts):
        w = float(cnt) / float(n_scale)
        score = score + w * sss_loss_pallas(
            x_true, x_pred, int(n_fft), overlap=overlap, eps=eps)
    return score


# ----------------------------- pure-JAX reference ---------------------------

def _frame(x, n_fft, hop):
    _, L = x.shape
    n_frames = 1 + (L - n_fft) // hop
    idx = np.arange(n_frames)[:, None] * hop + np.arange(n_fft)[None, :]
    return x[:, idx]  # (B, T, N)


def _sss_loss_ref(x_true, x_pred, n_fft, overlap=0.75, eps=1e-7):
    hop = int(n_fft * (1 - overlap))
    cw, sw = _dft_cos_sin(n_fft)
    ft = _frame(x_true, n_fft, hop)
    fp = _frame(x_pred, n_fft, hop)

    def mag(f):
        r = jnp.einsum('btn,nf->btf', f, cw)
        i = jnp.einsum('btn,nf->btf', f, sw)
        return jnp.sqrt(r * r + i * i)

    st, sp = mag(ft), mag(fp)
    conv = jnp.mean(jnp.sqrt(jnp.sum((st - sp) ** 2, axis=(1, 2)))
                    / jnp.sqrt(jnp.sum((st + sp) ** 2, axis=(1, 2))))
    log_term = jnp.mean(jnp.abs(jnp.log10(jnp.maximum(st, eps))
                                - jnp.log10(jnp.maximum(sp, eps))))
    return conv + log_term


if __name__ == "__main__":
    key = jax.random.PRNGKey(0)
    k_sel, k_t, k_p = jax.random.split(key, 3)

    B, L = 2, 512
    fft_min, fft_max, n_scale = 32, 48, 3

    x_true = jax.random.normal(k_t, (B, L), dtype=jnp.float32)
    x_pred = jax.random.normal(k_p, (B, L), dtype=jnp.float32)

    loss = rss_loss_pallas(x_true, x_pred, k_sel, fft_min, fft_max, n_scale)
    loss = jax.block_until_ready(loss)

    # Sanity check against a pure-JAX reference with the same fft draws.
    # Tolerance reflects the explicit bf16 quantization of frames/basis on
    # the MXU operands (f32 accumulation everywhere else).
    n_ffts = np.asarray(
        jax.random.randint(k_sel, (n_scale,), fft_min, fft_max + 1))
    ref = sum(_sss_loss_ref(x_true, x_pred, int(n)) for n in n_ffts) / n_scale
    ref = jax.block_until_ready(ref)

    assert np.isfinite(float(loss))
    np.testing.assert_allclose(float(loss), float(ref), rtol=2e-2, atol=2e-2)
    print("KERNEL_OK")
</pallas_src>

<mosaic_0001>
module attributes {stable_mosaic.version = 11 : i64} {
  func.func @_sss_kernel(%arg0: i32, %arg1: memref<2x32x128xbf16, #tpu.memory_space<vmem>>, %arg2: memref<2x32x128xbf16, #tpu.memory_space<vmem>>, %arg3: memref<128x256xbf16, #tpu.memory_space<vmem>>, %arg4: memref<1x8x128xf32, #tpu.memory_space<vmem>>) attributes {dimension_semantics = [#tpu.dimension_semantics<parallel>], iteration_bounds = array<i64: 2>, scalar_prefetch = 0 : i64, scratch_operands = 0 : i64, tpu.core_type = #tpu.core_type<tc>, window_params = [{transform_indices = @transform_0, window_bounds = array<i64: 2, 32, 128>}, {transform_indices = @transform_1, window_bounds = array<i64: 2, 32, 128>}, {pipeline_mode = #tpu.pipeline_mode<synchronous>, transform_indices = @transform_2, window_bounds = array<i64: 128, 256>}, {transform_indices = @transform_3, window_bounds = array<i64: 1, 8, 128>}]} {
    %0 = tpu.iota {dimensions = array<i32: 0>} : vector<8x128xi32>
    %1 = tpu.iota {dimensions = array<i32: 1>} : vector<8x128xi32>
    %cst = arith.constant 0.000000e+00 : f32
    %2 = vector.broadcast %cst : f32 to vector<8x128xf32>
    %c0 = arith.constant 0 : index
    %c0_0 = arith.constant 0 : index
    %3 = vector.load %arg3[%c0, %c0_0] : memref<128x256xbf16, #tpu.memory_space<vmem>>, vector<128x256xbf16>
    %c0_1 = arith.constant 0 : index
    %c0_2 = arith.constant 0 : index
    %c0_3 = arith.constant 0 : index
    %4 = vector.load %arg1[%c0_1, %c0_2, %c0_3] : memref<2x32x128xbf16, #tpu.memory_space<vmem>>, vector<1x32x128xbf16>
    %5 = vector.shape_cast %4 : vector<1x32x128xbf16> to vector<32x128xbf16>
    %cst_4 = arith.constant dense<0.000000e+00> : vector<32x256xf32>
    %6 = tpu.matmul %5, %3, %cst_4 {dimension_numbers = #tpu.dot_dimension_numbers<[1], [0], [0], [1], [0, 0, 1, 1], [], []>} : vector<32x128xbf16>, vector<128x256xbf16>, vector<32x256xf32> -> vector<32x256xf32>
    %c0_5 = arith.constant 0 : index
    %c0_6 = arith.constant 0 : index
    %c0_7 = arith.constant 0 : index
    %7 = vector.load %arg2[%c0_5, %c0_6, %c0_7] : memref<2x32x128xbf16, #tpu.memory_space<vmem>>, vector<1x32x128xbf16>
    %8 = vector.shape_cast %7 : vector<1x32x128xbf16> to vector<32x128xbf16>
    %cst_8 = arith.constant dense<0.000000e+00> : vector<32x256xf32>
    %9 = tpu.matmul %8, %3, %cst_8 {dimension_numbers = #tpu.dot_dimension_numbers<[1], [0], [0], [1], [0, 0, 1, 1], [], []>} : vector<32x128xbf16>, vector<128x256xbf16>, vector<32x256xf32> -> vector<32x256xf32>
    %10 = vector.extract_strided_slice %6 {offsets = [0, 0], sizes = [32, 128], strides = [1, 1]} : vector<32x256xf32> to vector<32x128xf32>
    %11 = arith.mulf %10, %10 : vector<32x128xf32>
    %12 = vector.extract_strided_slice %6 {offsets = [0, 128], sizes = [32, 128], strides = [1, 1]} : vector<32x256xf32> to vector<32x128xf32>
    %13 = arith.mulf %12, %12 : vector<32x128xf32>
    %14 = arith.addf %11, %13 : vector<32x128xf32>
    %15 = vector.extract_strided_slice %9 {offsets = [0, 0], sizes = [32, 128], strides = [1, 1]} : vector<32x256xf32> to vector<32x128xf32>
    %16 = arith.mulf %15, %15 : vector<32x128xf32>
    %17 = vector.extract_strided_slice %9 {offsets = [0, 128], sizes = [32, 128], strides = [1, 1]} : vector<32x256xf32> to vector<32x128xf32>
    %18 = arith.mulf %17, %17 : vector<32x128xf32>
    %19 = arith.addf %16, %18 : vector<32x128xf32>
    %20 = arith.mulf %14, %19 : vector<32x128xf32>
    %21 = math.sqrt %20 : vector<32x128xf32>
    %cst_9 = arith.constant 9.99999982E-15 : f32
    %22 = vector.broadcast %cst_9 : f32 to vector<32x128xf32>
    %23 = arith.maximumf %14, %22 : vector<32x128xf32>
    %24 = math.log %23 : vector<32x128xf32>
    %cst_10 = arith.constant 9.99999982E-15 : f32
    %25 = vector.broadcast %cst_10 : f32 to vector<32x128xf32>
    %26 = arith.maximumf %19, %25 : vector<32x128xf32>
    %27 = math.log %26 : vector<32x128xf32>
    %28 = arith.addf %14, %19 : vector<32x128xf32>
    %cst_11 = arith.constant dense<0.000000e+00> : vector<128xf32>
    %29 = vector.multi_reduction <add>, %28, %cst_11 [0] : vector<32x128xf32> to vector<128xf32>
    %30 = vector.shape_cast %29 : vector<128xf32> to vector<1x128xf32>
    %cst_12 = arith.constant dense<0.000000e+00> : vector<1xf32>
    %31 = vector.multi_reduction <add>, %30, %cst_12 [1] : vector<1x128xf32> to vector<1xf32>
    %32 = vector.shape_cast %31 : vector<1xf32> to vector<1x1xf32>
    %cst_13 = arith.constant dense<0.000000e+00> : vector<128xf32>
    %33 = vector.multi_reduction <add>, %21, %cst_13 [0] : vector<32x128xf32> to vector<128xf32>
    %34 = vector.shape_cast %33 : vector<128xf32> to vector<1x128xf32>
    %cst_14 = arith.constant dense<0.000000e+00> : vector<1xf32>
    %35 = vector.multi_reduction <add>, %34, %cst_14 [1] : vector<1x128xf32> to vector<1xf32>
    %36 = vector.shape_cast %35 : vector<1xf32> to vector<1x1xf32>
    %37 = arith.subf %24, %27 : vector<32x128xf32>
    %38 = math.absf %37 : vector<32x128xf32>
    %cst_15 = arith.constant dense<0.000000e+00> : vector<128xf32>
    %39 = vector.multi_reduction <add>, %38, %cst_15 [0] : vector<32x128xf32> to vector<128xf32>
    %40 = vector.shape_cast %39 : vector<128xf32> to vector<1x128xf32>
    %cst_16 = arith.constant dense<0.000000e+00> : vector<1xf32>
    %41 = vector.multi_reduction <add>, %40, %cst_16 [1] : vector<1x128xf32> to vector<1xf32>
    %42 = vector.shape_cast %41 : vector<1xf32> to vector<1x1xf32>
    %c0_i32 = arith.constant 0 : i32
    %43 = vector.broadcast %c0_i32 : i32 to vector<8x128xi32>
    %44 = arith.cmpi eq, %1, %43 : vector<8x128xi32>
    %cst_17 = arith.constant 0.000000e+00 : f32
    %45 = vector.shape_cast %32 : vector<1x1xf32> to vector<1x1xf32>
    %46 = vector.broadcast %45 : vector<1x1xf32> to vector<8x128xf32>
    %47 = vector.broadcast %cst_17 : f32 to vector<8x128xf32>
    %48 = arith.select %44, %46, %47 : vector<8x128xi1>, vector<8x128xf32>
    %c1_i32 = arith.constant 1 : i32
    %49 = vector.broadcast %c1_i32 : i32 to vector<8x128xi32>
    %50 = arith.cmpi eq, %1, %49 : vector<8x128xi32>
    %cst_18 = arith.constant 0.000000e+00 : f32
    %51 = vector.shape_cast %36 : vector<1x1xf32> to vector<1x1xf32>
    %52 = vector.broadcast %51 : vector<1x1xf32> to vector<8x128xf32>
    %53 = vector.broadcast %cst_18 : f32 to vector<8x128xf32>
    %54 = arith.select %50, %52, %53 : vector<8x128xi1>, vector<8x128xf32>
    %55 = arith.addf %48, %54 : vector<8x128xf32>
    %c2_i32 = arith.constant 2 : i32
    %56 = vector.broadcast %c2_i32 : i32 to vector<8x128xi32>
    %57 = arith.cmpi eq, %1, %56 : vector<8x128xi32>
    %cst_19 = arith.constant 0.000000e+00 : f32
    %58 = vector.shape_cast %42 : vector<1x1xf32> to vector<1x1xf32>
    %59 = vector.broadcast %58 : vector<1x1xf32> to vector<8x128xf32>
    %60 = vector.broadcast %cst_19 : f32 to vector<8x128xf32>
    %61 = arith.select %57, %59, %60 : vector<8x128xi1>, vector<8x128xf32>
    %62 = arith.addf %55, %61 : vector<8x128xf32>
    %c0_i32_20 = arith.constant 0 : i32
    %63 = vector.broadcast %c0_i32_20 : i32 to vector<8x128xi32>
    %64 = arith.cmpi eq, %0, %63 : vector<8x128xi32>
    %cst_21 = arith.constant 0.000000e+00 : f32
    %65 = vector.broadcast %cst_21 : f32 to vector<8x128xf32>
    %66 = arith.select %64, %62, %65 : vector<8x128xi1>, vector<8x128xf32>
    %67 = arith.addf %2, %66 : vector<8x128xf32>
    %c1 = arith.constant 1 : index
    %c0_22 = arith.constant 0 : index
    %c0_23 = arith.constant 0 : index
    %68 = vector.load %arg1[%c1, %c0_22, %c0_23] : memref<2x32x128xbf16, #tpu.memory_space<vmem>>, vector<1x32x128xbf16>
    %69 = vector.shape_cast %68 : vector<1x32x128xbf16> to vector<32x128xbf16>
    %cst_24 = arith.constant dense<0.000000e+00> : vector<32x256xf32>
    %70 = tpu.matmul %69, %3, %cst_24 {dimension_numbers = #tpu.dot_dimension_numbers<[1], [0], [0], [1], [0, 0, 1, 1], [], []>} : vector<32x128xbf16>, vector<128x256xbf16>, vector<32x256xf32> -> vector<32x256xf32>
    %c1_25 = arith.constant 1 : index
    %c0_26 = arith.constant 0 : index
    %c0_27 = arith.constant 0 : index
    %71 = vector.load %arg2[%c1_25, %c0_26, %c0_27] : memref<2x32x128xbf16, #tpu.memory_space<vmem>>, vector<1x32x128xbf16>
    %72 = vector.shape_cast %71 : vector<1x32x128xbf16> to vector<32x128xbf16>
    %cst_28 = arith.constant dense<0.000000e+00> : vector<32x256xf32>
    %73 = tpu.matmul %72, %3, %cst_28 {dimension_numbers = #tpu.dot_dimension_numbers<[1], [0], [0], [1], [0, 0, 1, 1], [], []>} : vector<32x128xbf16>, vector<128x256xbf16>, vector<32x256xf32> -> vector<32x256xf32>
    %74 = vector.extract_strided_slice %70 {offsets = [0, 0], sizes = [32, 128], strides = [1, 1]} : vector<32x256xf32> to vector<32x128xf32>
    %75 = arith.mulf %74, %74 : vector<32x128xf32>
    %76 = vector.extract_strided_slice %70 {offsets = [0, 128], sizes = [32, 128], strides = [1, 1]} : vector<32x256xf32> to vector<32x128xf32>
    %77 = arith.mulf %76, %76 : vector<32x128xf32>
    %78 = arith.addf %75, %77 : vector<32x128xf32>
    %79 = vector.extract_strided_slice %73 {offsets = [0, 0], sizes = [32, 128], strides = [1, 1]} : vector<32x256xf32> to vector<32x128xf32>
    %80 = arith.mulf %79, %79 : vector<32x128xf32>
    %81 = vector.extract_strided_slice %73 {offsets = [0, 128], sizes = [32, 128], strides = [1, 1]} : vector<32x256xf32> to vector<32x128xf32>
    %82 = arith.mulf %81, %81 : vector<32x128xf32>
    %83 = arith.addf %80, %82 : vector<32x128xf32>
    %84 = arith.mulf %78, %83 : vector<32x128xf32>
    %85 = math.sqrt %84 : vector<32x128xf32>
    %cst_29 = arith.constant 9.99999982E-15 : f32
    %86 = vector.broadcast %cst_29 : f32 to vector<32x128xf32>
    %87 = arith.maximumf %78, %86 : vector<32x128xf32>
    %88 = math.log %87 : vector<32x128xf32>
    %cst_30 = arith.constant 9.99999982E-15 : f32
    %89 = vector.broadcast %cst_30 : f32 to vector<32x128xf32>
    %90 = arith.maximumf %83, %89 : vector<32x128xf32>
    %91 = math.log %90 : vector<32x128xf32>
    %92 = arith.addf %78, %83 : vector<32x128xf32>
    %cst_31 = arith.constant dense<0.000000e+00> : vector<128xf32>
    %93 = vector.multi_reduction <add>, %92, %cst_31 [0] : vector<32x128xf32> to vector<128xf32>
    %94 = vector.shape_cast %93 : vector<128xf32> to vector<1x128xf32>
    %cst_32 = arith.constant dense<0.000000e+00> : vector<1xf32>
    %95 = vector.multi_reduction <add>, %94, %cst_32 [1] : vector<1x128xf32> to vector<1xf32>
    %96 = vector.shape_cast %95 : vector<1xf32> to vector<1x1xf32>
    %cst_33 = arith.constant dense<0.000000e+00> : vector<128xf32>
    %97 = vector.multi_reduction <add>, %85, %cst_33 [0] : vector<32x128xf32> to vector<128xf32>
    %98 = vector.shape_cast %97 : vector<128xf32> to vector<1x128xf32>
    %cst_34 = arith.constant dense<0.000000e+00> : vector<1xf32>
    %99 = vector.multi_reduction <add>, %98, %cst_34 [1] : vector<1x128xf32> to vector<1xf32>
    %100 = vector.shape_cast %99 : vector<1xf32> to vector<1x1xf32>
    %101 = arith.subf %88, %91 : vector<32x128xf32>
    %102 = math.absf %101 : vector<32x128xf32>
    %cst_35 = arith.constant dense<0.000000e+00> : vector<128xf32>
    %103 = vector.multi_reduction <add>, %102, %cst_35 [0] : vector<32x128xf32> to vector<128xf32>
    %104 = vector.shape_cast %103 : vector<128xf32> to vector<1x128xf32>
    %cst_36 = arith.constant dense<0.000000e+00> : vector<1xf32>
    %105 = vector.multi_reduction <add>, %104, %cst_36 [1] : vector<1x128xf32> to vector<1xf32>
    %106 = vector.shape_cast %105 : vector<1xf32> to vector<1x1xf32>
    %c0_i32_37 = arith.constant 0 : i32
    %107 = vector.broadcast %c0_i32_37 : i32 to vector<8x128xi32>
    %108 = arith.cmpi eq, %1, %107 : vector<8x128xi32>
    %cst_38 = arith.constant 0.000000e+00 : f32
    %109 = vector.shape_cast %96 : vector<1x1xf32> to vector<1x1xf32>
    %110 = vector.broadcast %109 : vector<1x1xf32> to vector<8x128xf32>
    %111 = vector.broadcast %cst_38 : f32 to vector<8x128xf32>
    %112 = arith.select %108, %110, %111 : vector<8x128xi1>, vector<8x128xf32>
    %c1_i32_39 = arith.constant 1 : i32
    %113 = vector.broadcast %c1_i32_39 : i32 to vector<8x128xi32>
    %114 = arith.cmpi eq, %1, %113 : vector<8x128xi32>
    %cst_40 = arith.constant 0.000000e+00 : f32
    %115 = vector.shape_cast %100 : vector<1x1xf32> to vector<1x1xf32>
    %116 = vector.broadcast %115 : vector<1x1xf32> to vector<8x128xf32>
    %117 = vector.broadcast %cst_40 : f32 to vector<8x128xf32>
    %118 = arith.select %114, %116, %117 : vector<8x128xi1>, vector<8x128xf32>
    %119 = arith.addf %112, %118 : vector<8x128xf32>
    %c2_i32_41 = arith.constant 2 : i32
    %120 = vector.broadcast %c2_i32_41 : i32 to vector<8x128xi32>
    %121 = arith.cmpi eq, %1, %120 : vector<8x128xi32>
    %cst_42 = arith.constant 0.000000e+00 : f32
    %122 = vector.shape_cast %106 : vector<1x1xf32> to vector<1x1xf32>
    %123 = vector.broadcast %122 : vector<1x1xf32> to vector<8x128xf32>
    %124 = vector.broadcast %cst_42 : f32 to vector<8x128xf32>
    %125 = arith.select %121, %123, %124 : vector<8x128xi1>, vector<8x128xf32>
    %126 = arith.addf %119, %125 : vector<8x128xf32>
    %c1_i32_43 = arith.constant 1 : i32
    %127 = vector.broadcast %c1_i32_43 : i32 to vector<8x128xi32>
    %128 = arith.cmpi eq, %0, %127 : vector<8x128xi32>
    %cst_44 = arith.constant 0.000000e+00 : f32
    %129 = vector.broadcast %cst_44 : f32 to vector<8x128xf32>
    %130 = arith.select %128, %126, %129 : vector<8x128xi1>, vector<8x128xf32>
    %131 = arith.addf %67, %130 : vector<8x128xf32>
    %132 = vector.shape_cast %131 : vector<8x128xf32> to vector<1x8x128xf32>
    %c0_45 = arith.constant 0 : index
    %c0_46 = arith.constant 0 : index
    %c0_47 = arith.constant 0 : index
    %133 = vector.load %arg4[%c0_45, %c0_46, %c0_47] : memref<1x8x128xf32, #tpu.memory_space<vmem>>, vector<1x8x128xf32>
    tpu.vector_store %arg4[%c0_45, %c0_46, %c0_47], %132 {strides = array<i32>} : memref<1x8x128xf32, #tpu.memory_space<vmem>>, vector<1x8x128xf32>,
    return
  }
  func.func @transform_0(%arg0: i32) -> (i32, i32, i32) {
    %c0_i32 = arith.constant 0 : i32
    %c0_i32_0 = arith.constant 0 : i32
    %c0_i32_1 = arith.constant 0 : i32
    return %c0_i32, %arg0, %c0_i32_0 : i32, i32, i32
  }
  func.func @transform_1(%arg0: i32) -> (i32, i32, i32) {
    %c0_i32 = arith.constant 0 : i32
    %c0_i32_0 = arith.constant 0 : i32
    %c0_i32_1 = arith.constant 0 : i32
    return %c0_i32, %arg0, %c0_i32_0 : i32, i32, i32
  }
  func.func @transform_2(%arg0: i32) -> (i32, i32) {
    %c0_i32 = arith.constant 0 : i32
    %c0_i32_0 = arith.constant 0 : i32
    %c0_i32_1 = arith.constant 0 : i32
    return %c0_i32, %c0_i32_0 : i32, i32
  }
  func.func @transform_3(%arg0: i32) -> (i32, i32, i32) {
    %c0_i32 = arith.constant 0 : i32
    %c0_i32_0 = arith.constant 0 : i32
    %c0_i32_1 = arith.constant 0 : i32
    return %arg0, %c0_i32, %c0_i32_0 : i32, i32, i32
  }
}

</mosaic_0001>

<bundles_post_ra>
// kernel: sss_loss_pallas.1
= control target key start
LH: loop header
LB: loop body
LE: loop exit
PB: predicated region body
PF: predicated region fallthrough
CT: control target
= control target key end

     0   :  { %s1257_s12 = smov 0   ;;  %s1259_s13 = smov 0   ;;  %s1464_s0 = inlined_call_operand.vmem [shape: bf16[2,64,128], index: 0, kind: input, shape index: {}]   ;;  %s1465_s1 = inlined_call_operand.vmem [shape: bf16[2,64,128], index: 1, kind: input, shape index: {}]   ;;  %s1466_s2 = inlined_call_operand.vmem [shape: bf16[128,256], index: 2, kind: input, shape index: {}]   ;;  %s1467_s3 = inlined_call_operand.vmem [shape: f32[2,8,128], index: 3, kind: output, shape index: {}]  }
   0x1   :  { %s1261_s14 = smov 0  }
   0x2 LB: > { %s1057_s15 = sadd.s32 4294967295, %s1234_s14   ;;  %s1274_s16 = sadd.s32 1, %s1234_s14   ;;  %s1234_s14 = sphi %s1261_s14, %s1471_s14   ;;  %s1230_s13 = sphi %s1259_s13, %s1470_s13   ;;  %s1226_s12 = sphi %s1257_s12, %s1469_s12  }
   0x3   : > { %s17_s17 = ssub.s32 %s1234_s14, %s1274_s16  ;;  %s20_s18 = sadd.s32 1, %s1230_s13 }
   0x4   : > { %p18_p0 = scmp.eq.s32.totalorder %s17_s17, 0  ;;  %p27_p1 = scmp.ne.s32.totalorder %s1230_s13, %s1226_s12 }
   0x5   : > { %p28_p2 = scmp.eq.s32.totalorder %s1234_s14, 0  ;;  %p1060_p4 = scmp.ge.s32.totalorder %s1234_s14, 2 }
   0x6   : > { %s1283_s19 = scalar_select %p18_p0, %s1230_s13, %s20_s18  }
   0x7   : > { %p1285_p3 = por %p28_p2, %p27_p1  ;;  %129 = sbr.rel (%p1060_p4) target bundleno = 28 (0x1c), region = 20 }
   0xe   : > { %132 = sbr.rel (!%p1285_p3) target bundleno = 21 (0x15), region = 24  ;;  %s134_s21 = sand.u32 (%p1285_p3), 1, %s1230_s13  }
   0xf   : > { %s1105_s22 = sshll.u32 (%p1285_p3), %s1234_s14, 4  ;;  %s1061_s23 = sshll.u32 (%p1285_p3), %s134_s21, 5 }
  0x10   : > { %s139_s26 = scalar_lea.vmem (%p1285_p3), %s1464_s0, %s1105_s22  ;;  %s136_s27 = scalar_lea.vmem (%p1285_p3), [#allocation2], %s1061_s23 }
  0x11   : > { %v155_v0 = vld [vmem:[%s139_s26] sm:$0xff] (%p1285_p3)   ;;  %v159_v1 = vld [vmem:[%s139_s26 + $0x8] sm:$0xff] (%p1285_p3)  }
  0x12   : > { %v163_v2 = vld [vmem:[%s139_s26 + $0x20] sm:$0xff] (%p1285_p3)   ;;  %156 = vst [vmem:[%s136_s27] sm:$0xff] (%p1285_p3), %v155_v0   ;;  %160 = vst [vmem:[%s136_s27 + $0x8] sm:$0xff] (%p1285_p3), %v159_v1   ;;  %v167_v3 = vld [vmem:[%s139_s26 + $0x28] sm:$0xff] (%p1285_p3)  }
  0x13   : > { %164 = vst [vmem:[%s136_s27 + $0x10] sm:$0xff] (%p1285_p3), %v163_v2   ;;  %168 = vst [vmem:[%s136_s27 + $0x18] sm:$0xff] (%p1285_p3), %v167_v3  }
  0x15 PF: > { %209 = sbr.rel (!%p1285_p3) target bundleno = 28 (0x1c), region = 65  ;;  %s211_s28 = sand.u32 (%p1285_p3), 1, %s1230_s13  }
  0x16   : > { %s1106_s29 = sshll.u32 (%p1285_p3), %s1234_s14, 4  ;;  %s1064_s30 = sshll.u32 (%p1285_p3), %s211_s28, 5 }
  0x17   : > { %s216_s6 = scalar_lea.vmem (%p1285_p3), %s1465_s1, %s1106_s29  ;;  %s213_s7 = scalar_lea.vmem (%p1285_p3), [#allocation3], %s1064_s30 }
  0x18   : > { %v232_v4 = vld [vmem:[%s216_s6] sm:$0xff] (%p1285_p3)   ;;  %v236_v5 = vld [vmem:[%s216_s6 + $0x8] sm:$0xff] (%p1285_p3)  }
  0x19   : > { %v240_v6 = vld [vmem:[%s216_s6 + $0x20] sm:$0xff] (%p1285_p3)   ;;  %233 = vst [vmem:[%s213_s7] sm:$0xff] (%p1285_p3), %v232_v4   ;;  %237 = vst [vmem:[%s213_s7 + $0x8] sm:$0xff] (%p1285_p3), %v236_v5   ;;  %v244_v7 = vld [vmem:[%s216_s6 + $0x28] sm:$0xff] (%p1285_p3)  }
  0x1a   : > { %241 = vst [vmem:[%s213_s7 + $0x10] sm:$0xff] (%p1285_p3), %v240_v6   ;;  %245 = vst [vmem:[%s213_s7 + $0x18] sm:$0xff] (%p1285_p3), %v244_v7  }
  0x1c PF: > { %p1067_p5 = scmp.ge.s32.totalorder %s1234_s14, 1  ;;  %p285_p6 = scmp.lt.s32.totalorder %s1234_s14, 3 }
  0x1e   : > { %p286_p7 = pnand %p1067_p5, %p285_p6 }
  0x1f   : > { %v1132_v8 = vld [vmem:[%s1466_s2 + $0x4] ss:$8 sps:$4 sm:$0xff] (!%p286_p7)   ;;  %v1134_v9 = vld [vmem:[%s1466_s2] ss:$8 sps:$4 sm:$0xff] (!%p286_p7)   ;;  %v1236_v10 = vmov (!%p286_p7), 0   ;;  %s292_s22 = sand.u32 (!%p286_p7), 1, %s1226_s12  }
  0x20   : > { %289 = sbr.rel (%p286_p7) target bundleno = 510 (0x1fe), region = 106  ;;  %480 = vmatprep.mubr.bf16.mxu0 (!%p286_p7), %v1236_v10  ;;  %549 = vmatprep.mubr.bf16.mxu1 (!%p286_p7), %v1236_v10  ;;  %v1135_v11 = vld [vmem:[%s1466_s2 + $0x14] ss:$8 sps:$4 sm:$0xff] (!%p286_p7)   ;;  %v1137_v12 = vld [vmem:[%s1466_s2 + $0x10] ss:$8 sps:$4 sm:$0xff] (!%p286_p7)   ;;  %s1068_s25 = sshll.u32 (!%p286_p7), %s292_s22, 5 }
  0x21   : > { %448 = vmatprep.subr.bf16.mxu0 (!%p286_p7), %v1132_v8  ;;  %517 = vmatprep.subr.bf16.mxu1 (!%p286_p7), %v1132_v8  ;;  %v1138_v13 = vld [vmem:[%s1466_s2 + $0x24] ss:$8 sps:$4 sm:$0xff] (!%p286_p7)   ;;  %v1140_v14 = vld [vmem:[%s1466_s2 + $0x20] ss:$8 sps:$4 sm:$0xff] (!%p286_p7)   ;;  %v1141_v15 = vld [vmem:[%s1466_s2 + $0x34] ss:$8 sps:$4 sm:$0xff] (!%p286_p7)  }
  0x22   : > { %449 = vmatpush1.bf16.msra.mxu0 (!%p286_p7), %v1134_v9  ;;  %518 = vmatpush1.bf16.msra.mxu1 (!%p286_p7), %v1134_v9  ;;  %s1330_s12 = scalar_lea.vmem (!%p286_p7), [#allocation2], %s1068_s25  ;;  %v1143_v16 = vld [vmem:[%s1466_s2 + $0x30] ss:$8 sps:$4 sm:$0xff] (!%p286_p7)   ;;  %s1335_s5 = scalar_lea.vmem (!%p286_p7), [#allocation3], %s1068_s25  ;;  %v1144_v17 = vld [vmem:[%s1466_s2 + $0x44] ss:$8 sps:$4 sm:$0xff] (!%p286_p7)  }
  0x23   : > { %450 = vmatprep.subr.bf16.mxu0 (!%p286_p7), %v1135_v11  ;;  %519 = vmatprep.subr.bf16.mxu1 (!%p286_p7), %v1135_v11  ;;  %v1146_v18 = vld [vmem:[%s1466_s2 + $0x40] ss:$8 sps:$4 sm:$0xff] (!%p286_p7)   ;;  %v1147_v19 = vld [vmem:[%s1466_s2 + $0x54] ss:$8 sps:$4 sm:$0xff] (!%p286_p7)   ;;  %v1149_v20 = vld [vmem:[%s1466_s2 + $0x50] ss:$8 sps:$4 sm:$0xff] (!%p286_p7)  }
  0x24   : > { %v1150_v21 = vld [vmem:[%s1466_s2 + $0x64] ss:$8 sps:$4 sm:$0xff] (!%p286_p7)   ;;  %v1152_v22 = vld [vmem:[%s1466_s2 + $0x60] ss:$8 sps:$4 sm:$0xff] (!%p286_p7)   ;;  %v1153_v23 = vld [vmem:[%s1466_s2 + $0x74] ss:$8 sps:$4 sm:$0xff] (!%p286_p7)  }
  0x25   : > { %v1155_v24 = vld [vmem:[%s1466_s2 + $0x70] ss:$8 sps:$4 sm:$0xff] (!%p286_p7)   ;;  %v1156_v25 = vld [vmem:[%s1330_s12] sm:$0xff] (!%p286_p7)   ;;  %v1158_v27 = vld [vmem:[%s1330_s12 + $0x8] sm:$0xff] (!%p286_p7)   ;;  %p327_p8 = scmp.lt.s32.totalorder (!%p286_p7), %s1057_s15, 1 }
  0x26   : > { %451 = vmatpush1.bf16.msra.mxu0 (!%p286_p7), %v1137_v12  ;;  %520 = vmatpush1.bf16.msra.mxu1 (!%p286_p7), %v1137_v12  ;;  %v1157_v26 = vld [vmem:[%s1335_s5] sm:$0xff] (!%p286_p7)   ;;  %v1159_v28 = vld [vmem:[%s1335_s5 + $0x8] sm:$0xff] (!%p286_p7)   ;;  %v1160_v29 = vld [vmem:[%s1330_s12 + $0x10] sm:$0xff] (!%p286_p7)  }
  0x27   : > { %452 = vmatprep.subr.bf16.mxu0 %v1138_v13  ;;  %521 = vmatprep.subr.bf16.mxu1 %v1138_v13  ;;  %v1161_v30 = vld [vmem:[%s1335_s5 + $0x10] sm:$0xff]   ;;  %v1162_v31 = vld [vmem:[%s1330_s12 + $0x18] sm:$0xff]   ;;  %s1473_s15 = smov (!%p327_p8, %s1057_s15), 1 }
  0x28   : > { %v1163_v32 = vld [vmem:[%s1335_s5 + $0x18] sm:$0xff]   ;;  %s1070_s28 = sshll.u32 %s1473_s15, 3 }
  0x29   : > { %s330_s30 = scalar_lea.vmem %s1467_s3, %s1070_s28 }
  0x2a   : > { %453 = vmatpush1.bf16.msra.mxu0 %v1140_v14  ;;  %522 = vmatpush1.bf16.msra.mxu1 %v1140_v14 }
  0x2b   : > { %454 = vmatprep.subr.bf16.mxu0 %v1141_v15  ;;  %523 = vmatprep.subr.bf16.mxu1 %v1141_v15 }
  0x2e   : > { %455 = vmatpush1.bf16.msra.mxu0 %v1143_v16  ;;  %524 = vmatpush1.bf16.msra.mxu1 %v1143_v16 }
  0x2f   : > { %456 = vmatprep.subr.bf16.mxu0 %v1144_v17  ;;  %525 = vmatprep.subr.bf16.mxu1 %v1144_v17 }
  0x32   : > { %457 = vmatpush1.bf16.msra.mxu0 %v1146_v18  ;;  %526 = vmatpush1.bf16.msra.mxu1 %v1146_v18 }
  0x33   : > { %458 = vmatprep.subr.bf16.mxu0 %v1147_v19  ;;  %527 = vmatprep.subr.bf16.mxu1 %v1147_v19 }
  0x36   : > { %459 = vmatpush1.bf16.msra.mxu0 %v1149_v20  ;;  %528 = vmatpush1.bf16.msra.mxu1 %v1149_v20 }
  0x37   : > { %460 = vmatprep.subr.bf16.mxu0 %v1150_v21  ;;  %529 = vmatprep.subr.bf16.mxu1 %v1150_v21 }
  0x3a   : > { %461 = vmatpush1.bf16.msra.mxu0 %v1152_v22  ;;  %530 = vmatpush1.bf16.msra.mxu1 %v1152_v22 }
  0x3b   : > { %462 = vmatprep.subr.bf16.mxu0 %v1153_v23  ;;  %531 = vmatprep.subr.bf16.mxu1 %v1153_v23 }
  0x3e   : > { %463 = vmatpush1.bf16.msra.mxu0 %v1155_v24  ;;  %532 = vmatpush1.bf16.msra.mxu1 %v1155_v24 }
  0x3f   : > { %723 = vmatprep.subr.bf16.mxu0 %v1132_v8  ;;  %793 = vmatprep.subr.bf16.mxu1 %v1132_v8 }
  0x41   : > { %481 = vmatmul.mubr.bf16.vlgmr.msra.gmra.mrb[0].mxu0 %v1156_v25  ;;  %550 = vmatmul.mubr.bf16.vlgmr.msra.gmra.mrb[0].mxu1 %v1157_v26 }
  0x42   : > { %724 = vmatpush1.bf16.msra.mxu0 %v1134_v9  ;;  %794 = vmatpush1.bf16.msra.mxu1 %v1134_v9 }
  0x43   : > { %725 = vmatprep.subr.bf16.mxu0 %v1135_v11  ;;  %795 = vmatprep.subr.bf16.mxu1 %v1135_v11 }
  0x44   : > { %490 = vmatprep.mubr.bf16.mxu0 %v1236_v10  ;;  %559 = vmatprep.mubr.bf16.mxu1 %v1236_v10 }
  0x46   : > { %726 = vmatpush1.bf16.msra.mxu0 %v1137_v12  ;;  %796 = vmatpush1.bf16.msra.mxu1 %v1137_v12 }
  0x47   : > { %727 = vmatprep.subr.bf16.mxu0 %v1138_v13  ;;  %797 = vmatprep.subr.bf16.mxu1 %v1138_v13 }
  0x49   : > { %491 = vmatmul.mubr.bf16.gmra.mrb[4].mxu0 %v1158_v27  ;;  %560 = vmatmul.mubr.bf16.gmra.mrb[4].mxu1 %v1159_v28 }
  0x4a   : > { %728 = vmatpush1.bf16.msra.mxu0 %v1140_v14  ;;  %798 = vmatpush1.bf16.msra.mxu1 %v1140_v14 }
  0x4b   : > { %729 = vmatprep.subr.bf16.mxu0 %v1141_v15  ;;  %799 = vmatprep.subr.bf16.mxu1 %v1141_v15 }
  0x4c   : > { %755 = vmatprep.mubr.bf16.mxu0 %v1236_v10  ;;  %825 = vmatprep.mubr.bf16.mxu1 %v1236_v10 }
  0x4e   : > { %730 = vmatpush1.bf16.msra.mxu0 %v1143_v16  ;;  %800 = vmatpush1.bf16.msra.mxu1 %v1143_v16 }
  0x4f   : > { %731 = vmatprep.subr.bf16.mxu0 %v1144_v17  ;;  %801 = vmatprep.subr.bf16.mxu1 %v1144_v17 }
  0x52   : > { %732 = vmatpush1.bf16.msra.mxu0 %v1146_v18  ;;  %802 = vmatpush1.bf16.msra.mxu1 %v1146_v18 }
  0x53   : > { %733 = vmatprep.subr.bf16.mxu0 %v1147_v19  ;;  %803 = vmatprep.subr.bf16.mxu1 %v1147_v19 }
  0x56   : > { %734 = vmatpush1.bf16.msra.mxu0 %v1149_v20  ;;  %804 = vmatpush1.bf16.msra.mxu1 %v1149_v20 }
  0x57   : > { %735 = vmatprep.subr.bf16.mxu0 %v1150_v21  ;;  %805 = vmatprep.subr.bf16.mxu1 %v1150_v21 }
  0x5a   : > { %736 = vmatpush1.bf16.msra.mxu0 %v1152_v22  ;;  %806 = vmatpush1.bf16.msra.mxu1 %v1152_v22 }
  0x5b   : > { %737 = vmatprep.subr.bf16.mxu0 %v1153_v23  ;;  %807 = vmatprep.subr.bf16.mxu1 %v1153_v23 }
  0x5e   : > { %738 = vmatpush1.bf16.msra.mxu0 %v1155_v24  ;;  %808 = vmatpush1.bf16.msra.mxu1 %v1155_v24 }
  0x61   : > { %756 = vmatmul.mubr.bf16.vlgmr.msra.gmra.mrb[8].mxu0 %v1160_v29  ;;  %826 = vmatmul.mubr.bf16.vlgmr.msra.gmra.mrb[8].mxu1 %v1161_v30 }
  0x62   : > { %765 = vmatprep.mubr.bf16.mxu0 %v1236_v10  ;;  %835 = vmatprep.mubr.bf16.mxu1 %v1236_v10 }
  0x69   : > { %766 = vmatmul.mubr.bf16.gmra.mrb[12].mxu0 %v1162_v31  ;;  %836 = vmatmul.mubr.bf16.gmra.mrb[12].mxu1 %v1163_v32 }
 0x114   : > { %v482_v33 = vpop.f32.mrb[0].mxu0  ;;  %v551_v34 = vpop.f32.mrb[0].mxu1 }
 0x115   : > { %v570_v35 = vmul.f32 %v482_v33, %v482_v33  ;;  %v582_v36 = vmul.f32 %v551_v34, %v551_v34  ;;  %v484_v37 = vpop.f32.mrb[1].mxu0  ;;  %v553_v38 = vpop.f32.mrb[1].mxu1 }
 0x116   : > { %v574_v39 = vmul.f32 %v484_v37, %v484_v37  ;;  %v586_v40 = vmul.f32 %v553_v38, %v553_v38  ;;  %v486_v41 = vpop.f32.mrb[2].mxu0  ;;  %v555_v42 = vpop.f32.mrb[2].mxu1 }
 0x117   : > { %v571_v43 = vmul.f32 %v486_v41, %v486_v41  ;;  %v583_v44 = vmul.f32 %v555_v42, %v555_v42  ;;  %v488_v45 = vpop.f32.mrb[3].mxu0  ;;  %v557_v46 = vpop.f32.mrb[3].mxu1 }
 0x118   : > { %v578_v47 = vadd.f32 %v574_v39, %v570_v35  ;;  %v590_v48 = vadd.f32 %v586_v40, %v582_v36  ;;  %v575_v49 = vmul.f32 %v488_v45, %v488_v45  ;;  %v587_v50 = vmul.f32 %v557_v46, %v557_v46 }
 0x11a   : > { %v626_v51 = vmax.f32 %v578_v47, 1e-14  ;;  %v1375_v52 = vmul.f32 %v590_v48, %v578_v47  ;;  %v638_v53 = vmax.f32 %v590_v48, 1e-14  ;;  %v650_v54 = vadd.f32 %v590_v48, %v578_v47 }
 0x11b   : > { %v579_v55 = vadd.f32 %v575_v49, %v571_v43  ;;  %v591_v56 = vadd.f32 %v587_v50, %v583_v44 }
 0x11c   : > { %1164 = vlog2.f32 %v626_v51  ;;  %v492_v57 = vpop.f32.mrb[4].mxu0  ;;  %v561_v58 = vpop.f32.mrb[4].mxu1  ;;  %vm600_vm0 = vcmp.eq.f32.partialorder %v1375_v52, inf  ;;  %v603_v41 = vand.u32 2147483648, %v1375_v52  ;;  %vm602_vm2 = vcmp.eq.f32.partialorder %v1375_v52, 0.0 }
 0x11d   : > { %1166 = vrsqrt.f32 %v1375_v52  ;;  %v627_v59 = vmax.f32 %v579_v55, 1e-14  ;;  %v1378_v60 = vmul.f32 %v591_v56, %v579_v55  ;;  %v639_v61 = vmax.f32 %v591_v56, 1e-14  ;;  %v494_v62 = vpop.f32.mrb[5].mxu0  ;;  %v563_v63 = vpop.f32.mrb[5].mxu1 }
 0x11e   : > { %1168 = vlog2.f32 %v638_v53  ;;  %v651_v0 = vadd.f32 %v591_v56, %v579_v55  ;;  %v572_v1 = vmul.f32 %v492_v57, %v492_v57  ;;  %v584_v2 = vmul.f32 %v561_v58, %v561_v58  ;;  %v496_v3 = vpop.f32.mrb[6].mxu0  ;;  %v565_v4 = vpop.f32.mrb[6].mxu1 }
 0x11f   : > { %1170 = vlog2.f32 %v627_v59  ;;  %v576_v5 = vmul.f32 %v494_v62, %v494_v62  ;;  %v588_v6 = vmul.f32 %v563_v63, %v563_v63  ;;  %v573_v7 = vmul.f32 %v496_v3, %v496_v3  ;;  %v498_v8 = vpop.f32.mrb[7].mxu0  ;;  %v567_v9 = vpop.f32.mrb[7].mxu1 }
 0x120   : > { %1172 = vrsqrt.f32 %v1378_v60  ;;  %v654_v10 = vadd.f32 %v651_v0, %v650_v54  ;;  %v585_v11 = vmul.f32 %v565_v4, %v565_v4  ;;  %v577_v12 = vmul.f32 %v498_v8, %v498_v8 }
 0x121   : > { %1174 = vlog2.f32 %v639_v61  ;;  %v580_v13 = vadd.f32 %v576_v5, %v572_v1  ;;  %v592_v14 = vadd.f32 %v588_v6, %v584_v2  ;;  %v589_v15 = vmul.f32 %v567_v9, %v567_v9 }
 0x122   : > { %v581_v16 = vadd.f32 %v577_v12, %v573_v7  ;;  %vm607_vm1 = vcmp.eq.f32.partialorder %v1378_v60, inf  ;;  %v610_v45 = vand.u32 2147483648, %v1378_v60  ;;  %vm609_vm3 = vcmp.eq.f32.partialorder %v1378_v60, 0.0 }
 0x123   : > { %v628_v17 = vmax.f32 %v580_v13, 1e-14  ;;  %v1381_v18 = vmul.f32 %v592_v14, %v580_v13  ;;  %v640_v19 = vmax.f32 %v592_v14, 1e-14  ;;  %v652_v20 = vadd.f32 %v592_v14, %v580_v13 }
 0x124   : > { %v629_v21 = vmax.f32 %v581_v16, 1e-14  ;;  %v593_v22 = vadd.f32 %v589_v15, %v585_v11 }
 0x125   : > { %1176 = vlog2.f32 %v628_v17  ;;  %v655_v23 = vadd.f32 %v654_v10, %v652_v20  ;;  %vm614_vm4 = vcmp.eq.f32.partialorder %v1381_v18, inf  ;;  %v617_v53 = vand.u32 2147483648, %v1381_v18 }
 0x126   : > { %v1165_v24 = vpop.eup %1164  ;;  %1178 = vrsqrt.f32 %v1381_v18  ;;  %v1384_v25 = vmul.f32 %v593_v22, %v581_v16  ;;  %v641_v26 = vmax.f32 %v593_v22, 1e-14  ;;  %v653_v27 = vadd.f32 %v593_v22, %v581_v16 }
 0x127   : > { %v1167_v28 = vpop.eup %1166  ;;  %v631_v29 = vmul.f32 0.6931472, %v1165_v24  ;;  %1180 = vlog2.f32 %v640_v19  ;;  %vm616_vm5 = vcmp.eq.f32.partialorder %v1381_v18, 0.0 }
 0x128   : > { %v1169_v30 = vpop.eup %1168  ;;  %1182 = vlog2.f32 %v629_v21  ;;  %v656_v31 = vadd.f32 %v655_v23, %v653_v27  ;;  %v599_v32 = vmul.f32 %v1167_v28, %v1375_v52  ;;  %vm621_vm6 = vcmp.eq.f32.partialorder %v1384_v25, inf }
 0x129   : > { %v1171_v33 = vpop.eup %1170  ;;  %v643_v34 = vmul.f32 0.6931472, %v1169_v30  ;;  %1184 = vrsqrt.f32 %v1384_v25  ;;  %vm623_vm7 = vcmp.eq.f32.partialorder %v1384_v25, 0.0  ;;  %v624_v4 = vand.u32 2147483648, %v1384_v25 }
 0x12a   : > { %v1173_v35 = vpop.eup %1172  ;;  %v633_v36 = vmul.f32 0.6931472, %v1171_v33  ;;  %1186 = vlog2.f32 %v641_v26  ;;  %v657_v37 = vrot.slane %v656_v31, 4  ;;  %v601_v40 = vsel %vm600_vm0, %v1375_v52, %v599_v32 }
 0x12b   : > { %v1175_v38 = vpop.eup %1174  ;;  %v676_v39 = vsub.f32 %v631_v29, %v643_v34  ;;  %v606_v42 = vmul.f32 %v1173_v35, %v1378_v60  ;;  %v604_v49 = vsel %vm602_vm2, %v603_v41, %v601_v40 }
 0x12c   : > { %v645_v43 = vmul.f32 0.6931472, %v1175_v38  ;;  %v658_v44 = vadd.f32 %v657_v37, %v656_v31 }
 0x12d   : > { %v608_v46 = vsel %vm607_vm1, %v1378_v60, %v606_v42  ;;  %v680_v56 = vand.u32 2147483647, %v676_v39 }
 0x12e   : > { %v677_v47 = vsub.f32 %v633_v36, %v645_v43  ;;  %v659_v48 = vrot.slane %v658_v44, 2  ;;  %v611_v50 = vsel %vm609_vm3, %v610_v45, %v608_v46 }
 0x12f   : > { %v1177_v51 = vpop.eup %1176  ;;  %v665_v54 = vadd.f32 %v611_v50, %v604_v49 }
 0x130   : > { %v1179_v55 = vpop.eup %1178  ;;  %v681_v57 = vand.u32 2147483647, %v677_v47  ;;  %v635_v58 = vmul.f32 0.6931472, %v1177_v51  ;;  %v660_v59 = vadd.f32 %v659_v48, %v658_v44 }
 0x131   : > { %v1181_v52 = vpop.eup %1180  ;;  %v613_v61 = vmul.f32 %v1179_v55, %v1381_v18 }
 0x132   : > { %v1183_v60 = vpop.eup %1182  ;;  %v647_v62 = vmul.f32 0.6931472, %v1181_v52  ;;  %v661_v63 = vrot.slane %v660_v59, 1  ;;  %v684_v0 = vadd.f32 %v681_v57, %v680_v56 }
 0x133   : > { %v1185_v1 = vpop.eup %1184  ;;  %v637_v2 = vmul.f32 0.6931472, %v1183_v60  ;;  %v615_v3 = vsel %vm614_vm4, %v1381_v18, %v613_v61 }
 0x134   : > { %v1187_v5 = vpop.eup %1186  ;;  %v757_v6 = vpop.f32.mrb[8].mxu0  ;;  %v662_v8 = vadd.f32 %v661_v63, %v660_v59  ;;  %v618_v9 = vsel %vm616_vm5, %v617_v53, %v615_v3  ;;  %v620_v10 = vmul.f32 %v1185_v1, %v1384_v25  ;;  %v678_v11 = vsub.f32 %v635_v58, %v647_v62 }
 0x135   : > { %v827_v7 = vpop.f32.mrb[8].mxu1  ;;  %v649_v12 = vmul.f32 0.6931472, %v1187_v5  ;;  %v846_v13 = vmul.f32 %v757_v6, %v757_v6  ;;  %v759_v15 = vpop.f32.mrb[9].mxu0  ;;  %v666_v17 = vadd.f32 %v665_v54, %v618_v9 }
 0x136   : > { %v858_v14 = vmul.f32 %v827_v7, %v827_v7  ;;  %v829_v16 = vpop.f32.mrb[9].mxu1  ;;  %663 = vadd.xlane.f32.xlu0 %v662_v8  ;;  %v850_v18 = vmul.f32 %v759_v15, %v759_v15  ;;  %v761_v20 = vpop.f32.mrb[10].mxu0  ;;  %v622_v22 = vsel %vm621_vm6, %v1384_v25, %v620_v10  ;;  %v682_v23 = vand.u32 2147483647, %v678_v11 }
 0x137   : > { %v862_v19 = vmul.f32 %v829_v16, %v829_v16  ;;  %v831_v21 = vpop.f32.mrb[10].mxu1  ;;  %v847_v24 = vmul.f32 %v761_v20, %v761_v20  ;;  %v763_v27 = vpop.f32.mrb[11].mxu0  ;;  %v625_v29 = vsel %vm623_vm7, %v624_v4, %v622_v22  ;;  %v679_v30 = vsub.f32 %v637_v2, %v649_v12 }
 0x138   : > { %v859_v26 = vmul.f32 %v831_v21, %v831_v21  ;;  %v833_v28 = vpop.f32.mrb[11].mxu1  ;;  %v854_v31 = vadd.f32 %v850_v18, %v846_v13  ;;  %v851_v33 = vmul.f32 %v763_v27, %v763_v27  ;;  %v667_v35 = vadd.f32 %v666_v17, %v625_v29 }
 0x139   : > { %v866_v32 = vadd.f32 %v862_v19, %v858_v14  ;;  %v863_v34 = vmul.f32 %v833_v28, %v833_v28  ;;  %v683_v36 = vand.u32 2147483647, %v679_v30  ;;  %v685_v37 = vadd.f32 %v684_v0, %v682_v23 }
 0x13a   : > { %v902_v38 = vmax.f32 %v854_v31, 1e-14  ;;  %v855_v42 = vadd.f32 %v851_v33, %v847_v24  ;;  %v668_v46 = vrot.slane %v667_v35, 4 }
 0x13b   : > { %v1413_v39 = vmul.f32 %v866_v32, %v854_v31  ;;  %v914_v40 = vmax.f32 %v866_v32, 1e-14  ;;  %v926_v41 = vadd.f32 %v866_v32, %v854_v31  ;;  %v867_v43 = vadd.f32 %v863_v34, %v859_v26 }
 0x13c   : > { %v686_v44 = vadd.f32 %v685_v37, %v683_v36  ;;  %1188 = vlog2.f32 %v902_v38  ;;  %v767_v45 = vpop.f32.mrb[12].mxu0  ;;  %v837_v25 = vpop.f32.mrb[12].mxu1  ;;  %v903_v47 = vmax.f32 %v855_v42, 1e-14  ;;  %v669_v5 = vadd.f32 %v668_v46, %v667_v35 }
 0x13d   : > { %1190 = vrsqrt.f32 %v1413_v39  ;;  %v1416_v48 = vmul.f32 %v867_v43, %v855_v42  ;;  %v915_v49 = vmax.f32 %v867_v43, 1e-14  ;;  %v769_v50 = vpop.f32.mrb[13].mxu0  ;;  %v839_v51 = vpop.f32.mrb[13].mxu1  ;;  %v927_v53 = vadd.f32 %v867_v43, %v855_v42 }
 0x13e   : > { %1192 = vlog2.f32 %v914_v40  ;;  %v848_v54 = vmul.f32 %v767_v45, %v767_v45  ;;  %v860_v55 = vmul.f32 %v837_v25, %v837_v25  ;;  %v771_v56 = vpop.f32.mrb[14].mxu0  ;;  %v841_v57 = vpop.f32.mrb[14].mxu1  ;;  %v852_v58 = vmul.f32 %v769_v50, %v769_v50 }
 0x13f   : > { %1194 = vlog2.f32 %v903_v47  ;;  %v864_v59 = vmul.f32 %v839_v51, %v839_v51  ;;  %v849_v52 = vmul.f32 %v771_v56, %v771_v56  ;;  %v773_v61 = vpop.f32.mrb[15].mxu0  ;;  %v843_v60 = vpop.f32.mrb[15].mxu1  ;;  %v930_v62 = vadd.f32 %v927_v53, %v926_v41 }
 0x140   : > { %1196 = vrsqrt.f32 %v1416_v48  ;;  %v861_v63 = vmul.f32 %v841_v57, %v841_v57  ;;  %v853_v0 = vmul.f32 %v773_v61, %v773_v61  ;;  %v856_v1 = vadd.f32 %v852_v58, %v848_v54 }
 0x141   : > { %1198 = vlog2.f32 %v915_v49  ;;  %v868_v2 = vadd.f32 %v864_v59, %v860_v55  ;;  %v865_v3 = vmul.f32 %v843_v60, %v843_v60  ;;  %v687_v6 = vrot.slane %v686_v44, 4 }
 0x142   : > { %v857_v4 = vadd.f32 %v853_v0, %v849_v52  ;;  %v904_v7 = vmax.f32 %v856_v1, 1e-14  ;;  %v670_v13 = vrot.slane %v669_v5, 2  ;;  %vm876_vm8 = vcmp.eq.f32.partialorder %v1413_v39, inf }
 0x143   : > { %v1419_v8 = vmul.f32 %v868_v2, %v856_v1  ;;  %v916_v9 = vmax.f32 %v868_v2, 1e-14  ;;  %v928_v10 = vadd.f32 %v868_v2, %v856_v1  ;;  %v869_v12 = vadd.f32 %v865_v3, %v861_v63 }
 0x144   : > { %v905_v11 = vmax.f32 %v857_v4, 1e-14  ;;  %v688_v14 = vadd.f32 %v687_v6, %v686_v44  ;;  %1200 = vlog2.f32 %v904_v7  ;;  %v671_v22 = vadd.f32 %v670_v13, %v669_v5 }
 0x145   : > { %v931_v15 = vadd.f32 %v930_v62, %v928_v10  ;;  %1202 = vrsqrt.f32 %v1419_v8  ;;  %v1422_v17 = vmul.f32 %v869_v12, %v857_v4  ;;  %v917_v18 = vmax.f32 %v869_v12, 1e-14 }
 0x146   : > { %v1189_v16 = vpop.eup %1188  ;;  %v929_v19 = vadd.f32 %v869_v12, %v857_v4  ;;  %1204 = vlog2.f32 %v916_v9  ;;  %v689_v23 = vrot.slane %v688_v14, 2  ;;  %v672_v30 = vrot.slane %v671_v22, 1 }
 0x147   : > { %v1191_v20 = vpop.eup %1190  ;;  %v907_v21 = vmul.f32 0.6931472, %v1189_v16  ;;  %1206 = vlog2.f32 %v905_v11  ;;  %vm878_vm9 = vcmp.eq.f32.partialorder %v1413_v39, 0.0  ;;  %v879_v44 = vand.u32 2147483648, %v1413_v39 }
 0x148   : > { %v1193_v24 = vpop.eup %1192  ;;  %v932_v26 = vadd.f32 %v931_v15, %v929_v19  ;;  %v875_v27 = vmul.f32 %v1191_v20, %v1413_v39  ;;  %1208 = vrsqrt.f32 %v1422_v17  ;;  %v690_v31 = vadd.f32 %v689_v23, %v688_v14 }
 0x149   : > { %v1195_v28 = vpop.eup %1194  ;;  %v919_v29 = vmul.f32 0.6931472, %v1193_v24  ;;  %1210 = vlog2.f32 %v917_v18  ;;  %v673_v37 = vadd.f32 %v672_v30, %v671_v22  ;;  %vm883_vm10 = vcmp.eq.f32.partialorder %v1416_v48, inf }
 0x14a   : > { %v1197_v32 = vpop.eup %1196  ;;  %v909_v33 = vmul.f32 0.6931472, %v1195_v28  ;;  %v933_v34 = vrot.slane %v932_v26, 4  ;;  %v691_v38 = vrot.slane %v690_v31, 1  ;;  %v877_v42 = vsel %vm876_vm8, %v1413_v39, %v875_v27 }
 0x14b   : > { %v1199_v35 = vpop.eup %1198  ;;  %v952_v36 = vsub.f32 %v907_v21, %v919_v29  ;;  %v882_v43 = vmul.f32 %v1197_v32, %v1416_v48  ;;  %674 = vadd.xlane.f32.xlu0 %v673_v37  ;;  %v886_v45 = vand.u32 2147483648, %v1416_v48  ;;  %vm885_vm11 = vcmp.eq.f32.partialorder %v1416_v48, 0.0 }
 0x14c   : > { %v921_v40 = vmul.f32 0.6931472, %v1199_v35  ;;  %v934_v41 = vadd.f32 %v933_v34, %v932_v26  ;;  %v692_v51 = vadd.f32 %v691_v38, %v690_v31  ;;  %v880_v53 = vsel %vm878_vm9, %v879_v44, %v877_v42 }
 0x14d   : > { %v884_v47 = vsel %vm883_vm10, %v1416_v48, %v882_v43  ;;  %v956_v50 = vand.u32 2147483647, %v952_v36  ;;  %vm890_vm12 = vcmp.eq.f32.partialorder %v1419_v8, inf  ;;  %v893_v48 = vand.u32 2147483648, %v1419_v8 }
 0x14e   : > { %v953_v25 = vsub.f32 %v909_v33, %v921_v40  ;;  %v935_v46 = vrot.slane %v934_v41, 2  ;;  %v1201_v49 = vpop.eup %1200  ;;  %v887_v54 = vsel %vm885_vm11, %v886_v45, %v884_v47  ;;  %vm892_vm13 = vcmp.eq.f32.partialorder %v1419_v8, 0.0 }
 0x14f   : > { %v1203_v55 = vpop.eup %1202  ;;  %v911_v57 = vmul.f32 0.6931472, %v1201_v49  ;;  %v941_v39 = vadd.f32 %v887_v54, %v880_v53  ;;  %693 = vadd.xlane.f32.xlu0 %v692_v51  ;;  %vm897_vm14 = vcmp.eq.f32.partialorder %v1422_v17, inf  ;;  %v900_v10 = vand.u32 2147483648, %v1422_v17 }
 0x150   : > { %v957_v56 = vand.u32 2147483647, %v953_v25  ;;  %v936_v58 = vadd.f32 %v935_v46, %v934_v41  ;;  %v1205_v59 = vpop.eup %1204  ;;  %v889_v52 = vmul.f32 %v1203_v55, %v1419_v8  ;;  %vm899_vm15 = vcmp.eq.f32.partialorder %v1422_v17, 0.0 }
 0x151   : > { %v1207_v61 = vpop.eup %1206  ;;  %v923_v60 = vmul.f32 0.6931472, %v1205_v59  ;;  %v332_v33 = vlaneseq }
 0x152   : > { %v937_v62 = vrot.slane %v936_v58, 1  ;;  %v960_v63 = vadd.f32 %v957_v56, %v956_v50  ;;  %v1209_v0 = vpop.eup %1208  ;;  %v913_v1 = vmul.f32 0.6931472, %v1207_v61  ;;  %v891_v2 = vsel %vm890_vm12, %v1419_v8, %v889_v52 }
 0x153   : > { %v1211_v3 = vpop.eup %1210  ;;  %v894_v5 = vsel %vm892_vm13, %v893_v48, %v891_v2  ;;  %v896_v6 = vmul.f32 %v1209_v0, %v1422_v17  ;;  %v954_v7 = vsub.f32 %v911_v57, %v923_v60  ;;  %v335_v35 = vand.u32 127, %v332_v33 }
 0x154   : > { %v938_v4 = vadd.f32 %v937_v62, %v936_v58  ;;  %v925_v9 = vmul.f32 0.6931472, %v1211_v3  ;;  %v942_v11 = vadd.f32 %v941_v39, %v894_v5  ;;  %v333_v42 = vshrl.u32 %v332_v33, 7 }
 0x155   : > { %v898_v12 = vsel %vm897_vm14, %v1422_v17, %v896_v6  ;;  %v958_v13 = vand.u32 2147483647, %v954_v7  ;;  %vm697_vm0 = vcmp.eq.s32.totalorder %v335_v35, 1  ;;  %vm695_vm1 = vcmp.eq.s32.totalorder %v335_v35, 0 }
 0x156   : > { %939 = vadd.xlane.f32.xlu1 %v938_v4  ;;  %v901_v14 = vsel %vm899_vm15, %v900_v10, %v898_v12  ;;  %v955_v8 = vsub.f32 %v913_v1, %v925_v9  ;;  %vm700_vm2 = vcmp.eq.s32.totalorder %v335_v35, 2  ;;  %vm703_vm3 = vcmp.eq.s32.totalorder %v333_v42, 0 }
 0x157   : > { %v943_v15 = vadd.f32 %v942_v11, %v901_v14  ;;  %v961_v16 = vadd.f32 %v960_v63, %v958_v13  ;;  %vm976_vm4 = vcmp.eq.s32.totalorder %v333_v42, 1 }
 0x158   : > { %v959_v18 = vand.u32 2147483647, %v955_v8 }
 0x159   : > { %v944_v19 = vrot.slane %v943_v15, 4 }
 0x15a   : > { %v962_v20 = vadd.f32 %v961_v16, %v959_v18 }
 0x15b   : > { %v945_v21 = vadd.f32 %v944_v19, %v943_v15 }
 0x15c   : > { %v963_v22 = vrot.slane %v962_v20, 4 }
 0x15d   : > { %v946_v23 = vrot.slane %v945_v21, 2 }
 0x15e   : > { %v964_v24 = vadd.f32 %v963_v22, %v962_v20 }
 0x15f   : > { %v947_v26 = vadd.f32 %v946_v23, %v945_v21 }
 0x160   : > { %v965_v27 = vrot.slane %v964_v24, 2 }
 0x161   : > { %v948_v28 = vrot.slane %v947_v26, 1 }
 0x162   : > { %v966_v29 = vadd.f32 %v965_v27, %v964_v24 }
 0x163   : > { %v949_v30 = vadd.f32 %v948_v28, %v947_v26 }
 0x164   : > { %v967_v31 = vrot.slane %v966_v29, 1 }
 0x165   : > { %950 = vadd.xlane.f32.xlu1 %v949_v30 }
 0x166   : > { %v968_v17 = vadd.f32 %v967_v31, %v966_v29 }
 0x169   : > { %969 = vadd.xlane.f32.xlu1 %v968_v17 }
 0x1c3   : > { %v664_v32 = vpop.xlane.xlu0 %663 }
 0x1c4   : > { %v696_v41 = vsel %vm695_vm1, %v664_v32, 0.0 }
 0x1d8   : > { %v675_v34 = vpop.xlane.xlu0 %674 }
 0x1d9   : > { %v698_v38 = vsel %vm697_vm0, %v675_v34, 0.0 }
 0x1da   : > { %v699_v45 = vadd.f32 %v698_v38, %v696_v41 }
 0x1dc   : > { %v694_v37 = vpop.xlane.xlu0 %693 }
 0x1dd   : > { %v701_v43 = vsel %vm700_vm2, %v694_v37, 0.0 }
 0x1de   : > { %v702_v46 = vadd.f32 %v701_v43, %v699_v45 }
 0x1e0   : > { %v704_v53 = vsel %vm703_vm3, %v702_v46, 0.0 }
 0x1e3   : > { %v940_v36 = vpop.xlane.xlu1 %939 }
 0x1e4   : > { %v971_v25 = vsel %vm695_vm1, %v940_v36, 0.0 }
 0x1f2   : > { %v951_v40 = vpop.xlane.xlu1 %950 }
 0x1f3   : > { %v972_v44 = vsel %vm697_vm0, %v951_v40, 0.0 }
 0x1f4   : > { %v973_v47 = vadd.f32 %v972_v44, %v971_v25 }
 0x1f6   : > { %v970_v49 = vpop.xlane.xlu1 %969 }
 0x1f7   : > { %v974_v50 = vsel %vm700_vm2, %v970_v49, 0.0 }
 0x1f8   : > { %v975_v51 = vadd.f32 %v974_v50, %v973_v47 }
 0x1fa   : > { %v977_v54 = vsel %vm976_vm4, %v975_v51, 0.0 }
 0x1fb   : > { %v978_v55 = vadd.f32 %v977_v54, %v704_v53 }
 0x1fd   : > { %979 = vst [vmem:[%s330_s30] sm:$0xff] %v978_v55 }
 0x1fe PF: > { %p10_p9 = scmp.ge.s32.totalorder %s1274_s16, 4   ;;  %s1469_s12 = smov %s1230_s13 }
 0x1ff   : > { %s1470_s13 = smov %s1283_s19  ;;  %s1471_s14 = smov %s1274_s16 }
 0x200   :  { %12 = sbr.rel (!%p10_p9) target bundleno = 2 (0x2), region = 159 }

</bundles_post_ra>
